<compile_context>
chip_gen: v7x
topology: tpu7x:2x2x1
jax: 0.10.0
libtpu: 0.0.40
codegen_flags: <defaults>
</compile_context>

<pallas_src>
import jax
import jax.numpy as jnp
from jax import lax
from jax.experimental import pallas as pl
from jax.experimental.pallas import tpu as pltpu


def hept_kernel(q_ref, k_ref, o_ref, qsq_ref):
    # q_ref: (TQ, D), k_ref: (TK, D), o_ref: (TQ, TK), qsq_ref: (TQ, 1) scratch.
    q = q_ref[...]
    k = k_ref[...]

    # q tile is resident across the whole ki sweep (its index_map ignores ki),
    # so compute its squared-norm term only once per q tile.
    @pl.when(pl.program_id(2) == 0)
    def _():
        qf = q.astype(jnp.float32)
        qsq_ref[...] = -0.5 * jnp.sum(qf * qf, axis=-1, keepdims=True)

    # MXU: contract the last dim of both tiles directly (no transpose of k),
    # operands in their native dtype, f32 accumulation.
    cluster_sum = lax.dot_general(
        q, k,
        dimension_numbers=(((1,), (1,)), ((), ())),
        preferred_element_type=jnp.float32,
    )  # (TQ, TK) f32

    kf = k.astype(jnp.float32)
    k_sq_05 = -0.5 * jnp.sum(kf * kf, axis=-1, keepdims=True)    # (TK, 1)

    logits = cluster_sum + qsq_ref[...] + k_sq_05.T              # broadcast adds
    logits = jnp.minimum(logits, 0.0)                            # clamp(max=0.0)

    if o_ref.dtype == jnp.bfloat16:
        # Cast before exp: bf16 EUP on v6e/v7x; exact enough (|logits| rounding
        # only perturbs exp in [0,1] by <~5e-3 absolute).
        o_ref[...] = jnp.exp(logits.astype(jnp.bfloat16))
    else:
        o_ref[...] = jnp.exp(logits).astype(o_ref.dtype)


def _pick_tile(s, max_tile, align):
    """Largest `align`-multiple tile <= max_tile that divides s; if none, the
    largest aligned tile (edge tiles are then handled by the cdiv grid with
    masked partial reads/writes).  Full extent is returned for small s."""
    if s <= max_tile:
        return s                                   # full array dim: always legal
    top = max(align, (max_tile // align) * align)
    for t in range(top, align - 1, -align):
        if s % t == 0:
            return t
    return top                                     # cdiv grid + masked edge tile


def hept_forward(query, key, *, out_dtype=jnp.bfloat16,
                 max_tq=512, max_tk=1024,
                 core_parallel=False, out_buffer_count=2):
    """query, key: (B, H, S, D) -> (B, H, S, S) of `out_dtype`."""
    B, H, S, D = query.shape
    assert key.shape == (B, H, S, D)
    BH = B * H

    q2 = query.reshape(BH, S, D)
    k2 = key.reshape(BH, S, D)

    TQ = _pick_tile(S, max_tq, 8)     # output sublane dim: x8 (or full extent)
    TK = _pick_tile(S, max_tk, 128)   # output lane dim: x128 (or full extent)
    grid = (BH, pl.cdiv(S, TQ), pl.cdiv(S, TK))   # ki innermost -> resident q tile

    # ki carries the qsq scratch across steps -> must stay sequential.
    if core_parallel:
        dim_sem = (pltpu.CORE_PARALLEL, pltpu.PARALLEL, pltpu.ARBITRARY)
    else:
        dim_sem = ("parallel", "parallel", "arbitrary")

    out_spec_kwargs = {}
    if out_buffer_count is not None and out_buffer_count != 2:
        # Extra output buffer keeps another writeback DMA in flight (v6e).
        out_spec_kwargs["pipeline_mode"] = pl.Buffered(out_buffer_count)

    out = pl.pallas_call(
        hept_kernel,
        out_shape=jax.ShapeDtypeStruct((BH, S, S), out_dtype),
        grid_spec=pltpu.PrefetchScalarGridSpec(
            num_scalar_prefetch=0,
            grid=grid,
            in_specs=[
                # q tile: ignores ki -> DMA skipped while sweeping ki.
                pl.BlockSpec((pl.Squeezed(), TQ, D), lambda bh, qi, ki: (bh, qi, 0)),
                # k tile: ignores qi.
                pl.BlockSpec((pl.Squeezed(), TK, D), lambda bh, qi, ki: (bh, ki, 0)),
            ],
            out_specs=pl.BlockSpec(
                (pl.Squeezed(), TQ, TK),
                lambda bh, qi, ki: (bh, qi, ki),
                **out_spec_kwargs,
            ),
            scratch_shapes=[pltpu.VMEM((TQ, 1), jnp.float32)],
        ),
        compiler_params=pltpu.CompilerParams(dimension_semantics=dim_sem),
    )(q2, k2)

    return out.reshape(B, H, S, S)


def hept_reference(query, key):
    """Pure-JAX reference matching the PyTorch module exactly (f32)."""
    q_sq_05 = -0.5 * jnp.sum(query ** 2, axis=-1, keepdims=True)
    k_sq_05 = -0.5 * jnp.sum(key ** 2, axis=-1, keepdims=True)
    cluster_sum = jnp.einsum('...id,...jd->...ij', query, key)
    qk = cluster_sum + q_sq_05 + jnp.swapaxes(k_sq_05, -1, -2)
    return jnp.exp(jnp.minimum(qk, 0.0))


if __name__ == "__main__":
    # Module hyperparameters (synthetic, deterministic, small).
    n_heads = 4
    batch_size = 2
    seq_len = 8
    dim_per_head = 16

    key0 = jax.random.PRNGKey(0)
    kq, kk = jax.random.split(key0)
    query = jax.random.normal(
        kq, (batch_size, n_heads, seq_len, dim_per_head), dtype=jnp.float32)
    key_t = jax.random.normal(
        kk, (batch_size, n_heads, seq_len, dim_per_head), dtype=jnp.float32)

    ref = hept_reference(query, key_t)

    # 1) Default (bf16 output) path.
    out_bf16 = jax.block_until_ready(hept_forward(query, key_t))
    assert out_bf16.shape == (batch_size, n_heads, seq_len, seq_len)
    assert out_bf16.dtype == jnp.bfloat16
    assert jnp.allclose(out_bf16.astype(jnp.float32), ref, atol=2e-2, rtol=2e-2), \
        "bf16 path mismatch vs reference"

    # 2) Bit-tight f32 path.
    out_f32 = jax.block_until_ready(hept_forward(query, key_t, out_dtype=jnp.float32))
    assert jnp.allclose(out_f32, ref, atol=1e-5, rtol=1e-5), \
        "f32 path mismatch vs reference"

    # 3) Exercise the real multi-tile pipeline (divisor tiles, ki sweep > 1).
    kq2, kk2 = jax.random.split(jax.random.PRNGKey(1))
    qb = jax.random.normal(kq2, (1, 2, 384, 32), dtype=jnp.float32)
    kb = jax.random.normal(kk2, (1, 2, 384, 32), dtype=jnp.float32)
    out_b = jax.block_until_ready(hept_forward(qb, kb, max_tq=128, max_tk=128))
    assert jnp.allclose(out_b.astype(jnp.float32), hept_reference(qb, kb),
                        atol=2e-2, rtol=2e-2), "tiled path mismatch vs reference"

    # 4) Exercise the masked-edge-tile path (S not a multiple of the lane tile).
    kq3, kk3 = jax.random.split(jax.random.PRNGKey(2))
    qc = jax.random.normal(kq3, (1, 1, 200, 24), dtype=jnp.float32)
    kc = jax.random.normal(kk3, (1, 1, 200, 24), dtype=jnp.float32)
    out_c = jax.block_until_ready(hept_forward(qc, kc, max_tq=64, max_tk=128))
    assert jnp.allclose(out_c.astype(jnp.float32), hept_reference(qc, kc),
                        atol=2e-2, rtol=2e-2), "edge-tile path mismatch vs reference"

    print("KERNEL_OK")
</pallas_src>

<mosaic_0001>
module attributes {stable_mosaic.version = 11 : i64} {
  func.func @hept_kernel(%arg0: i32, %arg1: i32, %arg2: i32, %arg3: memref<1x8x16xf32, #tpu.memory_space<vmem>>, %arg4: memref<1x8x16xf32, #tpu.memory_space<vmem>>, %arg5: memref<1x8x8xbf16, #tpu.memory_space<vmem>>, %arg6: memref<8x1xf32, #tpu.memory_space<vmem>>) attributes {dimension_semantics = [#tpu.dimension_semantics<parallel>, #tpu.dimension_semantics<parallel>, #tpu.dimension_semantics<arbitrary>], iteration_bounds = array<i64: 8, 1, 1>, scalar_prefetch = 0 : i64, scratch_operands = 1 : i64, tpu.core_type = #tpu.core_type<tc>, window_params = [{transform_indices = @transform_0, window_bounds = array<i64: 1, 8, 16>}, {transform_indices = @transform_1, window_bounds = array<i64: 1, 8, 16>}, {transform_indices = @transform_2, window_bounds = array<i64: 1, 8, 8>}]} {
    %c0 = arith.constant 0 : index
    %c0_0 = arith.constant 0 : index
    %c0_1 = arith.constant 0 : index
    %0 = vector.load %arg3[%c0, %c0_0, %c0_1] : memref<1x8x16xf32, #tpu.memory_space<vmem>>, vector<1x8x16xf32>
    %1 = vector.shape_cast %0 : vector<1x8x16xf32> to vector<8x16xf32>
    %c0_2 = arith.constant 0 : index
    %c0_3 = arith.constant 0 : index
    %c0_4 = arith.constant 0 : index
    %2 = vector.load %arg4[%c0_2, %c0_3, %c0_4] : memref<1x8x16xf32, #tpu.memory_space<vmem>>, vector<1x8x16xf32>
    %3 = vector.shape_cast %2 : vector<1x8x16xf32> to vector<8x16xf32>
    %c0_i32 = arith.constant 0 : i32
    %4 = arith.cmpi eq, %arg2, %c0_i32 : i32
    %5 = arith.extui %4 : i1 to i32
    %c0_i32_5 = arith.constant 0 : i32
    %6 = arith.cmpi ne, %5, %c0_i32_5 : i32
    scf.if %6 {
      %26 = arith.mulf %1, %1 : vector<8x16xf32>
      %cst_14 = arith.constant dense<0.000000e+00> : vector<8xf32>
      %27 = vector.multi_reduction <add>, %26, %cst_14 [1] : vector<8x16xf32> to vector<8xf32>
      %28 = vector.shape_cast %27 : vector<8xf32> to vector<8x1xf32>
      %cst_15 = arith.constant -5.000000e-01 : f32
      %29 = vector.broadcast %cst_15 : f32 to vector<8x1xf32>
      %30 = arith.mulf %29, %28 : vector<8x1xf32>
      %c0_16 = arith.constant 0 : index
      %c0_17 = arith.constant 0 : index
      %31 = vector.load %arg6[%c0_16, %c0_17] : memref<8x1xf32, #tpu.memory_space<vmem>>, vector<8x1xf32>
      tpu.vector_store %arg6[%c0_16, %c0_17], %30 {strides = array<i32>} : memref<8x1xf32, #tpu.memory_space<vmem>>, vector<8x1xf32>,
    } else {
    }
    %cst = arith.constant dense<0.000000e+00> : vector<8x8xf32>
    %7 = tpu.matmul %1, %3, %cst {dimension_numbers = #tpu.dot_dimension_numbers<[1], [1], [0], [0], [0, 0, 1, 0], [], []>} : vector<8x16xf32>, vector<8x16xf32>, vector<8x8xf32> -> vector<8x8xf32>
    %8 = arith.mulf %3, %3 : vector<8x16xf32>
    %cst_6 = arith.constant dense<0.000000e+00> : vector<8xf32>
    %9 = vector.multi_reduction <add>, %8, %cst_6 [1] : vector<8x16xf32> to vector<8xf32>
    %10 = vector.shape_cast %9 : vector<8xf32> to vector<8x1xf32>
    %cst_7 = arith.constant -5.000000e-01 : f32
    %11 = vector.broadcast %cst_7 : f32 to vector<8x1xf32>
    %12 = arith.mulf %11, %10 : vector<8x1xf32>
    %c0_8 = arith.constant 0 : index
    %c0_9 = arith.constant 0 : index
    %13 = vector.load %arg6[%c0_8, %c0_9] : memref<8x1xf32, #tpu.memory_space<vmem>>, vector<8x1xf32>
    %14 = vector.broadcast %13 : vector<8x1xf32> to vector<8x8xf32>
    %15 = arith.addf %7, %14 : vector<8x8xf32>
    %16 = tpu.transpose %12, [1, 0] : vector<8x1xf32> -> vector<1x8xf32>
    %17 = vector.broadcast %16 : vector<1x8xf32> to vector<8x8xf32>
    %18 = arith.addf %15, %17 : vector<8x8xf32>
    %cst_10 = arith.constant 0.000000e+00 : f32
    %19 = vector.broadcast %cst_10 : f32 to vector<8x8xf32>
    %20 = arith.minimumf %18, %19 : vector<8x8xf32>
    %21 = arith.truncf %20 : vector<8x8xf32> to vector<8x8xbf16>
    %22 = math.exp %21 : vector<8x8xbf16>
    %c0_11 = arith.constant 0 : index
    %c0_12 = arith.constant 0 : index
    %c0_13 = arith.constant 0 : index
    %23 = vector.load %arg5[%c0_11, %c0_12, %c0_13] : memref<1x8x8xbf16, #tpu.memory_space<vmem>>, vector<1x8x8xbf16>
    %24 = vector.shape_cast %23 : vector<1x8x8xbf16> to vector<8x8xbf16>
    %25 = vector.shape_cast %22 : vector<8x8xbf16> to vector<1x8x8xbf16>
    tpu.vector_store %arg5[%c0_11, %c0_12, %c0_13], %25 {strides = array<i32>} : memref<1x8x8xbf16, #tpu.memory_space<vmem>>, vector<1x8x8xbf16>,
    return
  }
  func.func @transform_0(%arg0: i32, %arg1: i32, %arg2: i32) -> (i32, i32, i32) {
    %c0_i32 = arith.constant 0 : i32
    %c0_i32_0 = arith.constant 0 : i32
    return %arg0, %arg1, %c0_i32 : i32, i32, i32
  }
  func.func @transform_1(%arg0: i32, %arg1: i32, %arg2: i32) -> (i32, i32, i32) {
    %c0_i32 = arith.constant 0 : i32
    %c0_i32_0 = arith.constant 0 : i32
    return %arg0, %arg2, %c0_i32 : i32, i32, i32
  }
  func.func @transform_2(%arg0: i32, %arg1: i32, %arg2: i32) -> (i32, i32, i32) {
    %c0_i32 = arith.constant 0 : i32
    return %arg0, %arg1, %arg2 : i32, i32, i32
  }
}

</mosaic_0001>

<bundles_post_ra>
// kernel: tpu_custom_call.1
= control target key start
LH: loop header
LB: loop body
LE: loop exit
PB: predicated region body
PF: predicated region fallthrough
CT: control target
= control target key end

     0   :  { %7 = vsyncpa [#allocation4], 0  ;;  %s982_s0 = inlined_call_operand.hbm [shape: f32[8,8,16], index: 0, kind: input, shape index: {}]   ;;  %s983_s1 = inlined_call_operand.hbm [shape: f32[8,8,16], index: 1, kind: input, shape index: {}]   ;;  %s984_s2 = inlined_call_operand.hbm [shape: bf16[8,8,8], index: 2, kind: output, shape index: {}]  }
   0x1   :  { %9 = vsyncpa [#allocation4 + $0x1], 0 }
   0x2   :  { %10 = vsyncpa [#allocation7], 0 }
   0x3   :  { %12 = vsyncpa [#allocation7 + $0x1], 0 }
   0x4   :  { %13 = vsyncpa [#allocation5], 0 }
   0x5   :  { %15 = vsyncpa [#allocation5 + $0x1], 0  ;;  %s763_s9 = smov 0   ;;  %s765_s10 = smov 0  }
   0x6   :  { %s767_s11 = smov 0   ;;  %s769_s12 = smov 0  }
   0x7   :  { %s771_s13 = smov 0   ;;  %s773_s14 = smov 0  }
   0x8 LB: > { %s495_s15 = sadd.s32 4294967295, %s740_s14   ;;  %s496_s16 = sadd.s32 4294967294, %s740_s14   ;;  %s740_s14 = sphi %s773_s14, %s21_s14   ;;  %s736_s13 = sphi %s771_s13, %s1003_s13   ;;  %s732_s12 = sphi %s769_s12, %s1002_s12   ;;  %s728_s11 = sphi %s767_s11, %s1001_s11   ;;  %s724_s10 = sphi %s765_s10, %s1000_s10   ;;  %s720_s9 = sphi %s763_s9, %s999_s9  }
   0x9   : > { %s40_s17 = sadd.s32 1, %s736_s13  ;;  %s49_s18 = sadd.s32 1, %s728_s11 }
   0xa   : > { %p42_p0 = scmp.ge.s32.totalorder %s40_s17, 8  ;;  %p56_p1 = scmp.ne.s32.totalorder %s728_s11, %s724_s10 }
   0xb   : > { %p57_p2 = scmp.eq.s32.totalorder %s740_s14, 0  ;;  %p62_p3 = scmp.ne.s32.totalorder %s724_s10, %s720_s9 }
   0xc   : > { %s1005_s17 = smov (%p42_p0, %s40_s17), 0  ;;  %p63_p5 = scmp.eq.s32.totalorder %s495_s15, 0 }
   0xd   : > { %p804_p4 = por %p57_p2, %p56_p1  ;;  %s44_s20 = ssub.s32 %s736_s13, %s1005_s17 }
   0xe   : > { %p118_p6 = scmp.eq.s32.totalorder %s495_s15, 7  ;;  %p47_p7 = scmp.eq.s32.totalorder %s44_s20, 0 }
   0xf   : > { %p810_p8 = por %p63_p5, %p62_p3  ;;  %p124_p10 = scmp.eq.s32.totalorder %s496_s16, 7 }
  0x10   : > { %p814_p9 = por %p118_p6, %p56_p1  ;;  %p537_p12 = scmp.lt.s32.totalorder %s740_s14, 8 }
  0x11   : > { %s988_s21 = scalar_select %p810_p8, 1, 0 }
  0x12   : > { %s989_s22 = scalar_select %p814_p9, 1, 0 }
  0x13   : > { %s819_s23 = scalar_select %p47_p7, %s728_s11, %s49_s18  }
  0x14   : > { %p821_p11 = por %p124_p10, %p62_p3  ;;  %s827_s25 = sand.u32 1, %s728_s11  }
  0x15   : > { %s499_s26 = sshll.u32 %s827_s25, 3  ;;  %s500_s27 = sshll.u32 %s736_s13, 7 }
  0x16   : > { %s990_s24 = scalar_select %p821_p11, 1, 0 }
  0x17   : > { %s836_s30 = scalar_lea.hbm %s982_s0, %s500_s27  ;;  %s148_s3 = scalar_lea.vmem [#allocation3], %s499_s26 }
  0x18   : > { %s156_s4 = sshll.u32 %s148_s3, 4  ;;  %p844_p13 = pnand %p537_p12, %p804_p4  ;;  %s840_s4 = int_to_ptr.vmem [resolvable:$true] %s156_s4 }
  0x19   : > { %s145_s6 = scalar_lea.sflag [#allocation4], %s827_s25  ;;  %s594_s7 = scalar_lea.hbm %s836_s30, 128 }
  0x1a   : > { %p595_p2 = scmp.ne.s32.totalorder %s836_s30, %s594_s7  ;;  %p596_p3 = pneg %p844_p13 }
  0x1b   : > { %s599_s16 = scalar_lea.hbm %s982_s0, 1024  ;;  %p600_p4 = scmp.lt.u32.totalorder %s836_s30, %s982_s0 }
  0x1c   : > { %p597_p5 = pnand %p596_p3, %p595_p2  ;;  %p601_p7 = scmp.lt.u32.totalorder %s599_s16, %s594_s7 }
  0x1d   : > { %p603_p12 = scmp.lt.u32.totalorder %s594_s7, %s836_s30 }
  0x1e   : > { %p598_p6 = pneg %p597_p5  ;;  %p602_p10 = por %p601_p7, %p600_p4 }
  0x20   : > { %p604_p0 = por %p603_p12, %p602_p10 }
  0x22   : > { %p605_p1 = pnand %p604_p0, %p598_p6 }
  0x24   : > { %608 = shalt.err (!%p605_p1)
}
  0x25   : > { %s609_s20 = scalar_lea.vmem %s840_s4, 128  ;;  %s742_s28 = smov [#allocation3]  }
  0x26   : > { %p610_p2 = scmp.ne.s32.totalorder %s840_s4, %s609_s20  ;;  %s614_s29 = sshll.u32 %s742_s28, 4  ;;  %s615_s29 = int_to_ptr.vmem [resolvable:$false] %s614_s29 }
  0x27   : > { %s616_s3 = scalar_lea.vmem %s615_s29, 256  ;;  %p617_p9 = scmp.lt.s32.totalorder %s840_s4, %s615_s29 }
  0x28   : > { %p612_p5 = pnand %p610_p2, %p596_p3  ;;  %p618_p4 = scmp.lt.s32.totalorder %s616_s3, %s609_s20 }
  0x2a   : > { %p613_p11 = pneg %p612_p5  ;;  %p619_p7 = por %p618_p4, %p617_p9 }
  0x2c   : > { %p620_p10 = pnand %p619_p7, %p613_p11 }
  0x2e   : > { %623 = shalt.err (!%p620_p10)
}
  0x2f   : > { %529 = dma.hbm_to_vmem [thread:$0]  (!%p844_p13), %s836_s30, 128, %s840_s4, %s145_s6  }
  0x30   : > { %p992_p0 = scmp.lt.s32.totalorder %s740_s14, 9  ;;  %p993_p1 = scmp.ge.s32.totalorder %s740_s14, 1 }
  0x31   : > { %s889_s16 = scalar_lea.hbm %s983_s1, %s500_s27  ;;  %s167_s18 = scalar_lea.vmem [#allocation6], %s499_s26 }
  0x32   : > { %p880_p6 = pnand %p993_p1, %p992_p0  ;;  %s175_s19 = sshll.u32 %s167_s18, 4  ;;  %s176_s19 = int_to_ptr.vmem [resolvable:$true] %s175_s19 }
  0x33   : > { %s164_s30 = scalar_lea.sflag [#allocation7], %s827_s25  ;;  %s624_s4 = scalar_lea.hbm %s889_s16, 128 }
  0x34   : > { %s994_s7 = scalar_select %p880_p6, 1, 0 }
  0x35   : > { %p625_p9 = scmp.ne.s32.totalorder %s889_s16, %s624_s4  ;;  %s629_s27 = scalar_lea.hbm %s983_s1, 1024 }
  0x36   : > { %p630_p2 = scmp.lt.u32.totalorder %s889_s16, %s983_s1  ;;  %p631_p5 = scmp.lt.u32.totalorder %s629_s27, %s624_s4 }
  0x37   : > { %p627_p11 = pnand %p625_p9, %p596_p3  ;;  %p633_p7 = scmp.lt.u32.totalorder %s624_s4, %s889_s16 }
  0x38   : > { %p632_p4 = por %p631_p5, %p630_p2 }
  0x39   : > { %p628_p12 = pneg %p627_p11 }
  0x3a   : > { %p634_p10 = por %p633_p7, %p632_p4 }
  0x3c   : > { %p635_p0 = pnand %p634_p10, %p628_p12 }
  0x3e   : > { %638 = shalt.err (!%p635_p0)
}
  0x3f   : > { %s639_s25 = scalar_lea.vmem %s176_s19, 128  ;;  %s743_s26 = smov [#allocation6]  }
  0x40   : > { %p640_p1 = scmp.ne.s32.totalorder %s176_s19, %s639_s25  ;;  %s644_s3 = sshll.u32 %s743_s26, 4  ;;  %s645_s3 = int_to_ptr.vmem [resolvable:$false] %s644_s3 }
  0x41   : > { %s646_s8 = scalar_lea.vmem %s645_s3, 256  ;;  %p647_p8 = scmp.lt.s32.totalorder %s176_s19, %s645_s3 }
  0x42   : > { %p642_p9 = pnand %p640_p1, %p596_p3  ;;  %p648_p6 = scmp.lt.s32.totalorder %s646_s8, %s639_s25 }
  0x44   : > { %p643_p11 = pneg %p642_p9  ;;  %p649_p2 = por %p648_p6, %p647_p8 }
  0x46   : > { %p650_p5 = pnand %p649_p2, %p643_p11 }
  0x48   : > { %653 = shalt.err (!%p650_p5)
}
  0x49   : > { %532 = dma.hbm_to_vmem [thread:$0]  (!%p844_p13), %s889_s16, 128, %s176_s19, %s164_s30  }
  0x4a   : > { %p995_p12 = scmp.ne.s32.totalorder %s994_s7, 0 }
  0x4b   : > { %s916_s15 = sand.u32 (!%p995_p12), 1, %s724_s10   ;;  %p996_p3 = scmp.ne.s32.totalorder (!%p995_p12), %s988_s21, 0 }
  0x4c   : > { %184 = sbr.rel (%p995_p12) target bundleno = 448 (0x1c0), region = 28  ;;  %s504_s18 = sshll.u32 (!%p995_p12), %s916_s15, 3 }
  0x4d   : > { %s187_s4 = scalar_lea.sflag (!%p995_p12), [#allocation4], %s916_s15  ;;  %s190_s6 = scalar_lea.vmem (!%p995_p12), [#allocation3], %s504_s18 }
  0x53   : > { %707 = dma.done.wait (%p996_p3), %s187_s4, 128  }
  0x54   : > { %709 = vsyncadd (%p996_p3), %s187_s4, 4294967168  ;;  %s196_s5 = scalar_lea.sflag [#allocation7], %s916_s15  ;;  %s199_s16 = scalar_lea.vmem [#allocation6], %s504_s18 }
  0x55   : > { %711 = dma.done.wait (%p996_p3), %s196_s5, 128  }
  0x56   : > { %713 = vsyncadd (%p996_p3), %s196_s5, 4294967168  ;;  %v744_v0 = vmov 0.0   ;;  %vm745_vm0 = vmmov 0   ;;  %v225_v1 = vld [vmem:[%s190_s6] sm:$0xff]  ;;  %vm232_vm1 = vcmask 130048   ;;  %v226_v2 = vld [vmem:[%s199_s16] sm:$0xff]  ;;  %v359_v15 = vlaneseq }
  0x57   : > { %515 = vmatprep.subr.mxu0 %v744_v0  ;;  %517 = vmatprep.mubr.msk.f32.mxu0 %vm745_vm0, %v744_v0  ;;  %v231_v3 = vmul.f32 %v225_v1, %v225_v1  ;;  %v239_v4 = vmul.f32 %v226_v2, %v226_v2  ;;  %v746_v7 = vmov 0   ;;  %vm237_vm2 = vcmask 7168   ;;  %s506_s21 = sshll.u32 %s916_s15, 2  ;;  %s510_s7 = sshll.u32 %s732_s12, 6 }
  0x58   : > { %516 = vmatpush3.xpose.msk.msra.mxu0 %vm232_vm1, %v226_v2  ;;  %590 = vset.pattern.permute.xlu1 %v746_v7  ;;  %v360_v16 = vshrl.u32 %v359_v15, 7  ;;  %s224_s19 = scalar_lea.vmem [#allocation8], %s506_s21  ;;  %vm369_vm3 = vcmask 60416   ;;  %s934_s28 = scalar_lea.hbm %s984_s2, %s510_s7 }
  0x59   : > { %v233_v5 = vsel %vm232_vm1, %v231_v3, 0.0  ;;  %v241_v6 = vsel %vm232_vm1, %v239_v4, 0.0  ;;  %591 = vset.pattern.permute.xlu0 %v746_v7  ;;  %s387_s30 = sshll.u32 %s224_s19, 4  ;;  %s372_s29 = scalar_lea.sflag [#allocation5], %s916_s15  ;;  %s936_s30 = int_to_ptr.vmem [resolvable:$true] %s387_s30 }
  0x5a   : > { %234 = vadd.xlane.f32.xlu0 %v233_v5  ;;  %v361_v18 = vsub.s32 0, %v360_v16  ;;  %s654_s25 = scalar_lea.vmem %s936_s30, 64  ;;  %p997_p13 = scmp.ne.s32.totalorder %s989_s22, 0 }
  0x5b   : > { %518 = vmatmul.mubr.msk.f32.vlgmr.msra.gmra.mrb[0].mxu0 %vm232_vm1, %v225_v1  ;;  %p655_p8 = scmp.ne.s32.totalorder %s936_s30, %s654_s25  ;;  %s747_s12 = smov [#allocation8]  }
  0x5c   : > { %s658_s26 = sshll.u32 %s747_s12, 4  ;;  %s659_s26 = int_to_ptr.vmem [resolvable:$false] %s658_s26 }
  0x5d   : > { %p656_p6 = pnand %p655_p8, %p997_p13  ;;  %s660_s3 = scalar_lea.vmem %s659_s26, 128 }
  0x5e   : > { %242 = vadd.xlane.f32.xlu0 %v241_v6  ;;  %p661_p7 = scmp.lt.s32.totalorder %s936_s30, %s659_s26  ;;  %p662_p10 = scmp.lt.s32.totalorder %s660_s3, %s654_s25 }
  0x5f   : > { %p657_p4 = pneg %p656_p6 }
  0x60   : > { %p663_p0 = por %p662_p10, %p661_p7 }
  0x62   : > { %p664_p1 = pnand %p663_p0, %p657_p4 }
  0xe7   : > { %v235_v8 = vpop.xlane.xlu0 %234 }
  0xe8   : > { %v236_v9 = vmul.f32 -0.5, %v235_v8 }
  0xea   : > { %238 = vst.msk [vmem:[#allocation2] sm:$0xff] %vm237_vm2, %v236_v9 }
  0xeb   : > { %v243_v11 = vpop.xlane.xlu0 %242 }
  0xec   : > { %v244_v12 = vmul.f32 -0.5, %v243_v11 }
  0xf1   : > { %v245_v10 = vld [vmem:[#allocation2] sm:$0xff] }
  0xf2   : > { %248 = vperm.xlu1 %590, %v245_v10  }
 0x11b   : > { %327 = vxpose.xlu1.b32.start.end [1/1] (short) (narrow) %v244_v12, 8 }
 0x12e   : > { %v323_v13 = vpop.f32.mrb[0].mxu0 }
 0x12f   : > { %v519_v14 = vpop.f32.mrb[1].mxu0 }
 0x171   : > { %v249_v17 = vpop.permute.xlu1 %248 }
 0x172   : > { %v324_v20 = vadd.f32 %v323_v13, %v249_v17 }
 0x19b   : > { %v343_v19 = vpop.trf.xlu1 }
 0x19c   : > { %v362_v21 = vrot.slane %v343_v19, %v361_v18 }
 0x19e   : > { %v363_v22 = vadd.f32 %v362_v21, %v324_v20 }
 0x1a0   : > { %v364_v23 = vmin.f32 %v363_v22, 0.0 }
 0x1a2   : > { %v365_v24 = vpack.c.bf16 %v364_v23, %v364_v23 }
 0x1a4   : > { %v367_v25 = vmul.bf16 1069105081, %v365_v24 }
 0x1a6   : > { %592 = vpow.bf16 %v367_v25 }
 0x1b1   : > { %v593_v26 = vpop.eup %592 }
 0x1b2   : > { %370 = vst.msk [vmem:[%s224_s19] sm:$0xf] %vm369_vm3, %v593_v26 }
 0x1b3   : > { %667 = shalt.err (!%p664_p1)
}
 0x1b4   : > { %s668_s8 = scalar_lea.hbm %s934_s28, 64  ;;  %s672_s4 = scalar_lea.hbm %s984_s2, 512 }
 0x1b5   : > { %p669_p9 = scmp.ne.s32.totalorder %s934_s28, %s668_s8  ;;  %p673_p5 = scmp.lt.u32.totalorder %s934_s28, %s984_s2 }
 0x1b6   : > { %p674_p12 = scmp.lt.u32.totalorder %s672_s4, %s668_s8  ;;  %p676_p8 = scmp.lt.u32.totalorder %s668_s8, %s934_s28 }
 0x1b7   : > { %p670_p11 = pnand %p669_p9, %p997_p13 }
 0x1b8   : > { %p675_p3 = por %p674_p12, %p673_p5 }
 0x1b9   : > { %p671_p2 = pneg %p670_p11 }
 0x1ba   : > { %p677_p6 = por %p676_p8, %p675_p3 }
 0x1bc   : > { %p678_p4 = pnand %p677_p6, %p671_p2 }
 0x1be   : > { %681 = shalt.err (!%p678_p4)
}
 0x1bf   : > { %524 = dma.vmem_to_hbm [thread:$0]  (%p997_p13), %s936_s30, 64, %s934_s28, %s372_s29  }
 0x1c0 PF: > { %p538_p7 = scmp.ge.s32.totalorder %s740_s14, 2  ;;  %s399_s16 = sand.u32 1, %s720_s9  }
 0x1c1   : > { %p998_p10 = scmp.ne.s32.totalorder %s990_s24, 0  ;;  %s400_s21 = scalar_lea.sflag [#allocation5], %s399_s16 }
 0x1c3   : > { %p534_p0 = pnand %p538_p7, %p998_p10 }
 0x1c5   : > { %715 = dma.done.wait (!%p534_p0), %s400_s21, 64  }
 0x1c6   : > { %717 = vsyncadd (!%p534_p0), %s400_s21, 4294967232  ;;  %s21_s14 = sadd.s32 1, %s740_s14   ;;  %s999_s9 = smov %s724_s10 }
 0x1c7   : > { %p18_p1 = scmp.ge.s32.totalorder %s21_s14, 10   ;;  %s1000_s10 = smov %s728_s11 }
 0x1c8   : > { %s1001_s11 = smov %s819_s23  ;;  %s1002_s12 = smov %s736_s13 }
 0x1c9   : > { %s1003_s13 = smov %s1005_s17  ;;  %20 = sbr.rel (!%p18_p1) target bundleno = 8 (0x8), region = 90 }
 0x1d0   :  { %405 = vsyncpa [#allocation4], 1 }
 0x1d1   :  { %407 = vsyncpa [#allocation4 + $0x1], 1 }
 0x1d2   :  { %408 = vsyncpa [#allocation7], 1 }
 0x1d3   :  { %410 = vsyncpa [#allocation7 + $0x1], 1 }
 0x1d4   :  { %411 = vsyncpa [#allocation5], 1 }
 0x1d5   :  { %413 = vsyncpa [#allocation5 + $0x1], 1 }

</bundles_post_ra>
